<compile_context>
chip_gen: v7x
topology: tpu7x:2x2x1
jax: 0.10.0
libtpu: 0.0.40
codegen_flags: <defaults>
</compile_context>

<pallas_src>
import functools

import jax
import jax.numpy as jnp
from jax.experimental import pallas as pl
from jax.experimental.pallas import tpu as pltpu

TAU = 2.0       # LIF time constant
V_TH = 1.0      # LIF threshold
V_RESET = 0.0   # LIF hard-reset value
BN_EPS = 1e-5


# ----------------------------------------------------------- banded tap weights
def _banded_tap_weights(conv_w, W):
    """conv_w (Cout,Cin,3,3) -> (3, W*Cin, W*Cout) banded matrices, one per row tap.

    B[di, p*Cin+ci, w*Cout+co] = conv_w[co, ci, di, dj]  where p = w + dj - 1 and
    0 <= p < W.  Out-of-range column taps are simply absent, which implements the
    1-px zero padding along W.  The padding along H is handled by the per-band row
    ranges inside the kernel.
    """
    w_hwio = jnp.transpose(conv_w, (2, 3, 1, 0))           # (di, dj, Cin, Cout)
    W_i = W
    p = jnp.arange(W_i)[:, None, None]                     # input column
    w = jnp.arange(W_i)[None, :, None]                     # output column
    dj = jnp.arange(3)[None, None, :]
    band = (p == w + dj - 1).astype(conv_w.dtype)          # (W, W, 3) 0/1 band mask
    full = jnp.einsum('pwd,xdio->xpiwo', band, w_hwio)     # (3, W, Cin, W, Cout)
    Cin, Cout = conv_w.shape[1], conv_w.shape[0]
    return full.reshape(3, W_i * Cin, W_i * Cout).astype(jnp.bfloat16)


# ---------------------------------------------- conv3x3 + fused BN-statistics
def _conv3x3_stats_kernel(x_ref, b_ref, y_ref, sum_ref, ssq_ref, acc_ref, *, F, H):
    """One frame-batch of F frames.

    x_ref  : (F, H, W*Cin)      bf16 lane-dense frames (no halo in HBM)
    b_ref  : (3, W*Cin, W*Cout) bf16 banded tap weights (resident across the grid)
    y_ref  : (1, F*H, W*Cout)   bf16 lane-dense conv output
    sum/ssq: (1, 1, W*Cout)     f32 per-block partial stats (centered SSQ)
    acc_ref: (F*H, W*Cout)      f32 accumulator scratch
    """
    f32 = jnp.float32
    for f in range(F):                         # static unroll; F = batch (small)
        r0 = f * H
        # di = 1 (same row): all H rows, overwrites the accumulator.
        acc_ref[pl.ds(r0, H), :] = jnp.dot(
            x_ref[f], b_ref[1], preferred_element_type=f32)
        # di = 0 (row above): output rows 1..H-1 read input rows 0..H-2 (row -1 = pad).
        acc_ref[pl.ds(r0 + 1, H - 1), :] += jnp.dot(
            x_ref[f, :H - 1, :], b_ref[0], preferred_element_type=f32)
        # di = 2 (row below): output rows 0..H-2 read input rows 1..H-1 (row H = pad).
        acc_ref[pl.ds(r0, H - 1), :] += jnp.dot(
            x_ref[f, 1:, :], b_ref[2], preferred_element_type=f32)

    acc = acc_ref[...]                         # (F*H, W*Cout) f32, read once
    y_ref[0] = acc.astype(y_ref.dtype)         # full-lane bf16 store

    # Fused BN partial statistics: per-lane (i.e. per (column, channel)) sum and
    # sum-of-squares centered about the per-block per-lane mean.  The host combines
    # the groups with Chan's formula, so no E[x^2]-E[x]^2 cancellation.
    rows = F * H
    s = jnp.sum(acc, axis=0, keepdims=True)                     # (1, W*Cout)
    d = acc - s * (1.0 / rows)
    q = jnp.sum(d * d, axis=0, keepdims=True)
    sum_ref[0] = s
    ssq_ref[0] = q


def conv3x3_bn_stats(x_fhc, banded_w, T, B):
    """x_fhc: (T*B, H, W*Cin) bf16 -> (y (T, B*H, W*Cout) bf16, per-block stats)."""
    NF, H, K = x_fhc.shape
    C = banded_w.shape[-1]
    R = B * H
    # TODO(synk): for large H*W*Cout layers, additionally tile rows / Cout so the
    # double-buffered x/y tiles + f32 accumulator stay well under v7x's 64 MiB VMEM.
    kernel = functools.partial(_conv3x3_stats_kernel, F=B, H=H)
    return pl.pallas_call(
        kernel,
        out_shape=(jax.ShapeDtypeStruct((T, R, C), jnp.bfloat16),
                   jax.ShapeDtypeStruct((T, 1, C), jnp.float32),
                   jax.ShapeDtypeStruct((T, 1, C), jnp.float32)),
        grid=(T,),
        in_specs=[pl.BlockSpec((B, H, K), lambda i: (i, 0, 0)),
                  pl.BlockSpec(banded_w.shape, lambda i: (0, 0, 0))],
        out_specs=(pl.BlockSpec((1, R, C), lambda i: (i, 0, 0)),
                   pl.BlockSpec((1, 1, C), lambda i: (i, 0, 0)),
                   pl.BlockSpec((1, 1, C), lambda i: (i, 0, 0))),
        scratch_shapes=[pltpu.VMEM((R, C), jnp.float32)],
        compiler_params=pltpu.CompilerParams(dimension_semantics=("parallel",)),
    )(x_fhc, banded_w)


# ---------------------------------------------------- fused BN-apply + LIF step
def _bn_lif_kernel(scale_ref, shift_ref, y_ref, s_ref, v_ref):
    t = pl.program_id(1)

    @pl.when(t == 0)
    def _():
        v_ref[...] = jnp.full_like(v_ref, V_RESET)

    x = y_ref[0].astype(jnp.float32) * scale_ref[...] + shift_ref[...]   # BN apply
    v = v_ref[...] + (x - (v_ref[...] - V_RESET)) * (1.0 / TAU)          # LIF charge
    fire = v >= V_TH
    s_ref[0] = fire.astype(s_ref.dtype)                                  # spike (bf16)
    v_ref[...] = jnp.where(fire, V_RESET, v)                             # hard reset


def _pick_row_tile(R, C):
    # f32 membrane scratch capped at ~2 MiB: safe alongside the double-buffered bf16
    # y/spike tiles even on v7x's 64 MiB VMEM (v5e/v6e have plenty of headroom).
    max_rows = max(8, ((1 << 19) // max(C, 1)) // 8 * 8)
    if R <= max_rows:
        return R                       # block == full dim, always legal, no padding
    for tm in range(max_rows, 7, -1):  # divisor of R -> no HBM row-pad round trip
        if R % tm == 0 and tm % 8 == 0:
            return tm
    # TODO(synk): mask the tail tile in-kernel for prime-ish R instead of oversizing.
    return R


def bn_lif(y_trc, scale_row, shift_row):
    T, R, C = y_trc.shape
    tm = _pick_row_tile(R, C)
    return pl.pallas_call(
        _bn_lif_kernel,
        out_shape=jax.ShapeDtypeStruct((T, R, C), jnp.bfloat16),
        grid=(R // tm, T),                       # T innermost: membrane carried in VMEM
        in_specs=[pl.BlockSpec((1, C), lambda i, t: (0, 0)),
                  pl.BlockSpec((1, C), lambda i, t: (0, 0)),
                  pl.BlockSpec((1, tm, C), lambda i, t: (t, i, 0))],
        out_specs=pl.BlockSpec((1, tm, C), lambda i, t: (t, i, 0)),
        scratch_shapes=[pltpu.VMEM((tm, C), jnp.float32)],
        compiler_params=pltpu.CompilerParams(
            dimension_semantics=("parallel", "arbitrary")),
    )(scale_row, shift_row, y_trc)


# ------------------------------------------------------------------ glue (JAX)
@jax.jit
def conv_bn_lif_forward(x_tbchw, conv_w, gamma, beta):
    T, B, Cin, H, W = x_tbchw.shape
    Cout = conv_w.shape[0]

    # bf16 BEFORE the transpose (half the relayout traffic), lane-dense (W*Cin) rows,
    # no halo pad in HBM (padding is folded into the kernel).
    x = x_tbchw.astype(jnp.bfloat16).transpose(0, 1, 3, 4, 2)    # (T,B,H,W,Cin)
    x = x.reshape(T * B, H, W * Cin)

    banded_w = _banded_tap_weights(conv_w, W)                    # (3, W*Cin, W*Cout)

    y, s_g, q_g = conv3x3_bn_stats(x, banded_w, T, B)            # y: (T, B*H, W*Cout)

    # BatchNorm batch statistics (training mode, biased variance): Chan combine of the
    # per-(block, column) centered partials -> numerically robust.
    n = B * H                                  # elements per group per channel
    M = T * B * H * W                          # total elements per channel
    s_g = s_g.reshape(T, W, Cout)
    q_g = q_g.reshape(T, W, Cout)
    mu = jnp.sum(s_g, axis=(0, 1)) / M
    var = (jnp.sum(q_g, axis=(0, 1))
           + n * jnp.sum((s_g / n - mu) ** 2, axis=(0, 1))) / M
    scale = gamma / jnp.sqrt(var + BN_EPS)
    shift = beta - mu * scale

    C = W * Cout
    scale_row = jnp.tile(scale, W).reshape(1, C).astype(jnp.float32)
    shift_row = jnp.tile(shift, W).reshape(1, C).astype(jnp.float32)

    spikes = bn_lif(y, scale_row, shift_row)                     # (T, B*H, W*Cout) bf16

    # TODO(synk): a chained ConvBNLIF layer should consume the lane-dense bf16 spikes
    # directly; this transpose/cast only restores the PyTorch [T, B, C, H, W] float32
    # layout at the module boundary.
    out = spikes.reshape(T, B, H, W, Cout).transpose(0, 1, 4, 2, 3)
    return out.astype(x_tbchw.dtype)


# ------------------------------------------------------------------------ main
if __name__ == "__main__":
    T, B, Cin, Cout, H, W = 4, 2, 4, 8, 16, 16

    key = jax.random.PRNGKey(0)
    k_x, k_w, k_g, k_b = jax.random.split(key, 4)

    x = jax.random.normal(k_x, (T, B, Cin, H, W), dtype=jnp.float32)
    conv_w = jax.random.normal(k_w, (Cout, Cin, 3, 3), dtype=jnp.float32) * (
        2.0 / (Cin * 9)) ** 0.5
    gamma = 1.0 + 0.1 * jax.random.normal(k_g, (Cout,), dtype=jnp.float32)
    beta = 0.1 * jax.random.normal(k_b, (Cout,), dtype=jnp.float32)

    out = conv_bn_lif_forward(x, conv_w, gamma, beta)
    out = jax.block_until_ready(out)

    assert out.shape == (T, B, Cout, H, W)
    assert out.dtype == jnp.float32
    assert bool(jnp.all((out == 0.0) | (out == 1.0)))   # spikes are binary
    print("KERNEL_OK")
</pallas_src>

<mosaic_0001>
module attributes {stable_mosaic.version = 11 : i64} {
  func.func @_conv3x3_stats_kernel(%arg0: i32, %arg1: memref<2x16x64xbf16, #tpu.memory_space<vmem>>, %arg2: memref<3x64x128xbf16, #tpu.memory_space<vmem>>, %arg3: memref<1x32x128xbf16, #tpu.memory_space<vmem>>, %arg4: memref<1x1x128xf32, #tpu.memory_space<vmem>>, %arg5: memref<1x1x128xf32, #tpu.memory_space<vmem>>, %arg6: memref<32x128xf32, #tpu.memory_space<vmem>>) attributes {dimension_semantics = [#tpu.dimension_semantics<parallel>], iteration_bounds = array<i64: 4>, scalar_prefetch = 0 : i64, scratch_operands = 1 : i64, tpu.core_type = #tpu.core_type<tc>, window_params = [{transform_indices = @transform_0, window_bounds = array<i64: 2, 16, 64>}, {pipeline_mode = #tpu.pipeline_mode<synchronous>, transform_indices = @transform_1, window_bounds = array<i64: 3, 64, 128>}, {transform_indices = @transform_2, window_bounds = array<i64: 1, 32, 128>}, {transform_indices = @transform_3, window_bounds = array<i64: 1, 1, 128>}, {transform_indices = @transform_4, window_bounds = array<i64: 1, 1, 128>}]} {
    %c0 = arith.constant 0 : index
    %c0_0 = arith.constant 0 : index
    %c0_1 = arith.constant 0 : index
    %0 = vector.load %arg1[%c0, %c0_0, %c0_1] : memref<2x16x64xbf16, #tpu.memory_space<vmem>>, vector<1x16x64xbf16>
    %1 = vector.shape_cast %0 : vector<1x16x64xbf16> to vector<16x64xbf16>
    %c1 = arith.constant 1 : index
    %c0_2 = arith.constant 0 : index
    %c0_3 = arith.constant 0 : index
    %2 = vector.load %arg2[%c1, %c0_2, %c0_3] : memref<3x64x128xbf16, #tpu.memory_space<vmem>>, vector<1x64x128xbf16>
    %3 = vector.shape_cast %2 : vector<1x64x128xbf16> to vector<64x128xbf16>
    %cst = arith.constant dense<0.000000e+00> : vector<16x128xf32>
    %4 = tpu.matmul %1, %3, %cst {dimension_numbers = #tpu.dot_dimension_numbers<[1], [0], [0], [1], [0, 0, 1, 1], [], []>} : vector<16x64xbf16>, vector<64x128xbf16>, vector<16x128xf32> -> vector<16x128xf32>
    %c0_4 = arith.constant 0 : index
    %c0_5 = arith.constant 0 : index
    %5 = vector.load %arg6[%c0_4, %c0_5] : memref<32x128xf32, #tpu.memory_space<vmem>>, vector<16x128xf32>
    tpu.vector_store %arg6[%c0_4, %c0_5], %4 {strides = array<i32>} : memref<32x128xf32, #tpu.memory_space<vmem>>, vector<16x128xf32>,
    %c1_6 = arith.constant 1 : index
    %c0_7 = arith.constant 0 : index
    %6 = vector.load %arg6[%c1_6, %c0_7] : memref<32x128xf32, #tpu.memory_space<vmem>>, vector<15x128xf32>
    %c0_8 = arith.constant 0 : index
    %c0_9 = arith.constant 0 : index
    %c0_10 = arith.constant 0 : index
    %7 = vector.load %arg1[%c0_8, %c0_9, %c0_10] : memref<2x16x64xbf16, #tpu.memory_space<vmem>>, vector<1x15x64xbf16>
    %8 = vector.shape_cast %7 : vector<1x15x64xbf16> to vector<15x64xbf16>
    %c0_11 = arith.constant 0 : index
    %c0_12 = arith.constant 0 : index
    %c0_13 = arith.constant 0 : index
    %9 = vector.load %arg2[%c0_11, %c0_12, %c0_13] : memref<3x64x128xbf16, #tpu.memory_space<vmem>>, vector<1x64x128xbf16>
    %10 = vector.shape_cast %9 : vector<1x64x128xbf16> to vector<64x128xbf16>
    %cst_14 = arith.constant dense<0.000000e+00> : vector<15x128xf32>
    %11 = tpu.matmul %8, %10, %cst_14 {dimension_numbers = #tpu.dot_dimension_numbers<[1], [0], [0], [1], [0, 0, 1, 1], [], []>} : vector<15x64xbf16>, vector<64x128xbf16>, vector<15x128xf32> -> vector<15x128xf32>
    %12 = arith.addf %6, %11 : vector<15x128xf32>
    %c1_15 = arith.constant 1 : index
    %c0_16 = arith.constant 0 : index
    %13 = vector.load %arg6[%c1_15, %c0_16] : memref<32x128xf32, #tpu.memory_space<vmem>>, vector<15x128xf32>
    tpu.vector_store %arg6[%c1_15, %c0_16], %12 {strides = array<i32>} : memref<32x128xf32, #tpu.memory_space<vmem>>, vector<15x128xf32>,
    %c0_17 = arith.constant 0 : index
    %c0_18 = arith.constant 0 : index
    %14 = vector.load %arg6[%c0_17, %c0_18] : memref<32x128xf32, #tpu.memory_space<vmem>>, vector<15x128xf32>
    %c0_19 = arith.constant 0 : index
    %c1_20 = arith.constant 1 : index
    %c0_21 = arith.constant 0 : index
    %15 = vector.load %arg1[%c0_19, %c1_20, %c0_21] : memref<2x16x64xbf16, #tpu.memory_space<vmem>>, vector<1x15x64xbf16>
    %16 = vector.shape_cast %15 : vector<1x15x64xbf16> to vector<15x64xbf16>
    %c2 = arith.constant 2 : index
    %c0_22 = arith.constant 0 : index
    %c0_23 = arith.constant 0 : index
    %17 = vector.load %arg2[%c2, %c0_22, %c0_23] : memref<3x64x128xbf16, #tpu.memory_space<vmem>>, vector<1x64x128xbf16>
    %18 = vector.shape_cast %17 : vector<1x64x128xbf16> to vector<64x128xbf16>
    %cst_24 = arith.constant dense<0.000000e+00> : vector<15x128xf32>
    %19 = tpu.matmul %16, %18, %cst_24 {dimension_numbers = #tpu.dot_dimension_numbers<[1], [0], [0], [1], [0, 0, 1, 1], [], []>} : vector<15x64xbf16>, vector<64x128xbf16>, vector<15x128xf32> -> vector<15x128xf32>
    %20 = arith.addf %14, %19 : vector<15x128xf32>
    %c0_25 = arith.constant 0 : index
    %c0_26 = arith.constant 0 : index
    %21 = vector.load %arg6[%c0_25, %c0_26] : memref<32x128xf32, #tpu.memory_space<vmem>>, vector<15x128xf32>
    tpu.vector_store %arg6[%c0_25, %c0_26], %20 {strides = array<i32>} : memref<32x128xf32, #tpu.memory_space<vmem>>, vector<15x128xf32>,
    %c1_27 = arith.constant 1 : index
    %c0_28 = arith.constant 0 : index
    %c0_29 = arith.constant 0 : index
    %22 = vector.load %arg1[%c1_27, %c0_28, %c0_29] : memref<2x16x64xbf16, #tpu.memory_space<vmem>>, vector<1x16x64xbf16>
    %23 = vector.shape_cast %22 : vector<1x16x64xbf16> to vector<16x64xbf16>
    %c1_30 = arith.constant 1 : index
    %c0_31 = arith.constant 0 : index
    %c0_32 = arith.constant 0 : index
    %24 = vector.load %arg2[%c1_30, %c0_31, %c0_32] : memref<3x64x128xbf16, #tpu.memory_space<vmem>>, vector<1x64x128xbf16>
    %25 = vector.shape_cast %24 : vector<1x64x128xbf16> to vector<64x128xbf16>
    %cst_33 = arith.constant dense<0.000000e+00> : vector<16x128xf32>
    %26 = tpu.matmul %23, %25, %cst_33 {dimension_numbers = #tpu.dot_dimension_numbers<[1], [0], [0], [1], [0, 0, 1, 1], [], []>} : vector<16x64xbf16>, vector<64x128xbf16>, vector<16x128xf32> -> vector<16x128xf32>
    %c16 = arith.constant 16 : index
    %c0_34 = arith.constant 0 : index
    %27 = vector.load %arg6[%c16, %c0_34] : memref<32x128xf32, #tpu.memory_space<vmem>>, vector<16x128xf32>
    tpu.vector_store %arg6[%c16, %c0_34], %26 {strides = array<i32>} : memref<32x128xf32, #tpu.memory_space<vmem>>, vector<16x128xf32>,
    %c17 = arith.constant 17 : index
    %c0_35 = arith.constant 0 : index
    %28 = vector.load %arg6[%c17, %c0_35] : memref<32x128xf32, #tpu.memory_space<vmem>>, vector<15x128xf32>
    %c1_36 = arith.constant 1 : index
    %c0_37 = arith.constant 0 : index
    %c0_38 = arith.constant 0 : index
    %29 = vector.load %arg1[%c1_36, %c0_37, %c0_38] : memref<2x16x64xbf16, #tpu.memory_space<vmem>>, vector<1x15x64xbf16>
    %30 = vector.shape_cast %29 : vector<1x15x64xbf16> to vector<15x64xbf16>
    %c0_39 = arith.constant 0 : index
    %c0_40 = arith.constant 0 : index
    %c0_41 = arith.constant 0 : index
    %31 = vector.load %arg2[%c0_39, %c0_40, %c0_41] : memref<3x64x128xbf16, #tpu.memory_space<vmem>>, vector<1x64x128xbf16>
    %32 = vector.shape_cast %31 : vector<1x64x128xbf16> to vector<64x128xbf16>
    %cst_42 = arith.constant dense<0.000000e+00> : vector<15x128xf32>
    %33 = tpu.matmul %30, %32, %cst_42 {dimension_numbers = #tpu.dot_dimension_numbers<[1], [0], [0], [1], [0, 0, 1, 1], [], []>} : vector<15x64xbf16>, vector<64x128xbf16>, vector<15x128xf32> -> vector<15x128xf32>
    %34 = arith.addf %28, %33 : vector<15x128xf32>
    %c17_43 = arith.constant 17 : index
    %c0_44 = arith.constant 0 : index
    %35 = vector.load %arg6[%c17_43, %c0_44] : memref<32x128xf32, #tpu.memory_space<vmem>>, vector<15x128xf32>
    tpu.vector_store %arg6[%c17_43, %c0_44], %34 {strides = array<i32>} : memref<32x128xf32, #tpu.memory_space<vmem>>, vector<15x128xf32>,
    %c16_45 = arith.constant 16 : index
    %c0_46 = arith.constant 0 : index
    %36 = vector.load %arg6[%c16_45, %c0_46] : memref<32x128xf32, #tpu.memory_space<vmem>>, vector<15x128xf32>
    %c1_47 = arith.constant 1 : index
    %c1_48 = arith.constant 1 : index
    %c0_49 = arith.constant 0 : index
    %37 = vector.load %arg1[%c1_47, %c1_48, %c0_49] : memref<2x16x64xbf16, #tpu.memory_space<vmem>>, vector<1x15x64xbf16>
    %38 = vector.shape_cast %37 : vector<1x15x64xbf16> to vector<15x64xbf16>
    %c2_50 = arith.constant 2 : index
    %c0_51 = arith.constant 0 : index
    %c0_52 = arith.constant 0 : index
    %39 = vector.load %arg2[%c2_50, %c0_51, %c0_52] : memref<3x64x128xbf16, #tpu.memory_space<vmem>>, vector<1x64x128xbf16>
    %40 = vector.shape_cast %39 : vector<1x64x128xbf16> to vector<64x128xbf16>
    %cst_53 = arith.constant dense<0.000000e+00> : vector<15x128xf32>
    %41 = tpu.matmul %38, %40, %cst_53 {dimension_numbers = #tpu.dot_dimension_numbers<[1], [0], [0], [1], [0, 0, 1, 1], [], []>} : vector<15x64xbf16>, vector<64x128xbf16>, vector<15x128xf32> -> vector<15x128xf32>
    %42 = arith.addf %36, %41 : vector<15x128xf32>
    %c16_54 = arith.constant 16 : index
    %c0_55 = arith.constant 0 : index
    %43 = vector.load %arg6[%c16_54, %c0_55] : memref<32x128xf32, #tpu.memory_space<vmem>>, vector<15x128xf32>
    tpu.vector_store %arg6[%c16_54, %c0_55], %42 {strides = array<i32>} : memref<32x128xf32, #tpu.memory_space<vmem>>, vector<15x128xf32>,
    %c0_56 = arith.constant 0 : index
    %c0_57 = arith.constant 0 : index
    %44 = vector.load %arg6[%c0_56, %c0_57] : memref<32x128xf32, #tpu.memory_space<vmem>>, vector<32x128xf32>
    %45 = arith.truncf %44 : vector<32x128xf32> to vector<32x128xbf16>
    %c0_58 = arith.constant 0 : index
    %c0_59 = arith.constant 0 : index
    %c0_60 = arith.constant 0 : index
    %46 = vector.load %arg3[%c0_58, %c0_59, %c0_60] : memref<1x32x128xbf16, #tpu.memory_space<vmem>>, vector<1x32x128xbf16>
    %47 = vector.shape_cast %46 : vector<1x32x128xbf16> to vector<32x128xbf16>
    %48 = vector.shape_cast %45 : vector<32x128xbf16> to vector<1x32x128xbf16>
    tpu.vector_store %arg3[%c0_58, %c0_59, %c0_60], %48 {strides = array<i32>} : memref<1x32x128xbf16, #tpu.memory_space<vmem>>, vector<1x32x128xbf16>,
    %cst_61 = arith.constant dense<0.000000e+00> : vector<128xf32>
    %49 = vector.multi_reduction <add>, %44, %cst_61 [0] : vector<32x128xf32> to vector<128xf32>
    %50 = vector.shape_cast %49 : vector<128xf32> to vector<1x128xf32>
    %cst_62 = arith.constant 3.125000e-02 : f32
    %51 = vector.broadcast %cst_62 : f32 to vector<1x128xf32>
    %52 = arith.mulf %50, %51 : vector<1x128xf32>
    %53 = vector.broadcast %52 : vector<1x128xf32> to vector<32x128xf32>
    %54 = arith.subf %44, %53 : vector<32x128xf32>
    %55 = arith.mulf %54, %54 : vector<32x128xf32>
    %cst_63 = arith.constant dense<0.000000e+00> : vector<128xf32>
    %56 = vector.multi_reduction <add>, %55, %cst_63 [0] : vector<32x128xf32> to vector<128xf32>
    %57 = vector.shape_cast %56 : vector<128xf32> to vector<1x128xf32>
    %c0_64 = arith.constant 0 : index
    %c0_65 = arith.constant 0 : index
    %c0_66 = arith.constant 0 : index
    %58 = vector.load %arg4[%c0_64, %c0_65, %c0_66] : memref<1x1x128xf32, #tpu.memory_space<vmem>>, vector<1x1x128xf32>
    %59 = vector.shape_cast %58 : vector<1x1x128xf32> to vector<1x128xf32>
    %60 = vector.shape_cast %50 : vector<1x128xf32> to vector<1x1x128xf32>
    tpu.vector_store %arg4[%c0_64, %c0_65, %c0_66], %60 {strides = array<i32>} : memref<1x1x128xf32, #tpu.memory_space<vmem>>, vector<1x1x128xf32>,
    %c0_67 = arith.constant 0 : index
    %c0_68 = arith.constant 0 : index
    %c0_69 = arith.constant 0 : index
    %61 = vector.load %arg5[%c0_67, %c0_68, %c0_69] : memref<1x1x128xf32, #tpu.memory_space<vmem>>, vector<1x1x128xf32>
    %62 = vector.shape_cast %61 : vector<1x1x128xf32> to vector<1x128xf32>
    %63 = vector.shape_cast %57 : vector<1x128xf32> to vector<1x1x128xf32>
    tpu.vector_store %arg5[%c0_67, %c0_68, %c0_69], %63 {strides = array<i32>} : memref<1x1x128xf32, #tpu.memory_space<vmem>>, vector<1x1x128xf32>,
    return
  }
  func.func @transform_0(%arg0: i32) -> (i32, i32, i32) {
    %c0_i32 = arith.constant 0 : i32
    %c0_i32_0 = arith.constant 0 : i32
    %c0_i32_1 = arith.constant 0 : i32
    return %arg0, %c0_i32, %c0_i32_0 : i32, i32, i32
  }
  func.func @transform_1(%arg0: i32) -> (i32, i32, i32) {
    %c0_i32 = arith.constant 0 : i32
    %c0_i32_0 = arith.constant 0 : i32
    %c0_i32_1 = arith.constant 0 : i32
    %c0_i32_2 = arith.constant 0 : i32
    return %c0_i32, %c0_i32_0, %c0_i32_1 : i32, i32, i32
  }
  func.func @transform_2(%arg0: i32) -> (i32, i32, i32) {
    %c0_i32 = arith.constant 0 : i32
    %c0_i32_0 = arith.constant 0 : i32
    %c0_i32_1 = arith.constant 0 : i32
    return %arg0, %c0_i32, %c0_i32_0 : i32, i32, i32
  }
  func.func @transform_3(%arg0: i32) -> (i32, i32, i32) {
    %c0_i32 = arith.constant 0 : i32
    %c0_i32_0 = arith.constant 0 : i32
    %c0_i32_1 = arith.constant 0 : i32
    return %arg0, %c0_i32, %c0_i32_0 : i32, i32, i32
  }
  func.func @transform_4(%arg0: i32) -> (i32, i32, i32) {
    %c0_i32 = arith.constant 0 : i32
    %c0_i32_0 = arith.constant 0 : i32
    %c0_i32_1 = arith.constant 0 : i32
    return %arg0, %c0_i32, %c0_i32_0 : i32, i32, i32
  }
}

module attributes {stable_mosaic.version = 11 : i64} {
  func.func @_bn_lif_kernel(%arg0: i32, %arg1: i32, %arg2: memref<1x128xf32, #tpu.memory_space<vmem>>, %arg3: memref<1x128xf32, #tpu.memory_space<vmem>>, %arg4: memref<1x32x128xbf16, #tpu.memory_space<vmem>>, %arg5: memref<1x32x128xbf16, #tpu.memory_space<vmem>>, %arg6: memref<32x128xf32, #tpu.memory_space<vmem>>) attributes {dimension_semantics = [#tpu.dimension_semantics<parallel>, #tpu.dimension_semantics<arbitrary>], iteration_bounds = array<i64: 1, 4>, scalar_prefetch = 0 : i64, scratch_operands = 1 : i64, tpu.core_type = #tpu.core_type<tc>, window_params = [{pipeline_mode = #tpu.pipeline_mode<synchronous>, transform_indices = @transform_0, window_bounds = array<i64: 1, 128>}, {pipeline_mode = #tpu.pipeline_mode<synchronous>, transform_indices = @transform_1, window_bounds = array<i64: 1, 128>}, {transform_indices = @transform_2, window_bounds = array<i64: 1, 32, 128>}, {transform_indices = @transform_3, window_bounds = array<i64: 1, 32, 128>}]} {
    %c0_i32 = arith.constant 0 : i32
    %0 = arith.cmpi eq, %arg1, %c0_i32 : i32
    %1 = arith.extui %0 : i1 to i32
    %c0_i32_0 = arith.constant 0 : i32
    %2 = arith.cmpi ne, %1, %c0_i32_0 : i32
    scf.if %2 {
      %cst_19 = arith.constant 0.000000e+00 : f32
      %31 = vector.broadcast %cst_19 : f32 to vector<32x128xf32>
      %c0_20 = arith.constant 0 : index
      %c0_21 = arith.constant 0 : index
      %32 = vector.load %arg6[%c0_20, %c0_21] : memref<32x128xf32, #tpu.memory_space<vmem>>, vector<32x128xf32>
      tpu.vector_store %arg6[%c0_20, %c0_21], %31 {strides = array<i32>} : memref<32x128xf32, #tpu.memory_space<vmem>>, vector<32x128xf32>,
    } else {
    }
    %c0 = arith.constant 0 : index
    %c0_1 = arith.constant 0 : index
    %c0_2 = arith.constant 0 : index
    %3 = vector.load %arg4[%c0, %c0_1, %c0_2] : memref<1x32x128xbf16, #tpu.memory_space<vmem>>, vector<1x32x128xbf16>
    %4 = vector.shape_cast %3 : vector<1x32x128xbf16> to vector<32x128xbf16>
    %5 = arith.extf %4 : vector<32x128xbf16> to vector<32x128xf32>
    %c0_3 = arith.constant 0 : index
    %c0_4 = arith.constant 0 : index
    %6 = vector.load %arg2[%c0_3, %c0_4] : memref<1x128xf32, #tpu.memory_space<vmem>>, vector<1x128xf32>
    %7 = vector.broadcast %6 : vector<1x128xf32> to vector<32x128xf32>
    %8 = arith.mulf %5, %7 : vector<32x128xf32>
    %c0_5 = arith.constant 0 : index
    %c0_6 = arith.constant 0 : index
    %9 = vector.load %arg3[%c0_5, %c0_6] : memref<1x128xf32, #tpu.memory_space<vmem>>, vector<1x128xf32>
    %10 = vector.broadcast %9 : vector<1x128xf32> to vector<32x128xf32>
    %11 = arith.addf %8, %10 : vector<32x128xf32>
    %c0_7 = arith.constant 0 : index
    %c0_8 = arith.constant 0 : index
    %12 = vector.load %arg6[%c0_7, %c0_8] : memref<32x128xf32, #tpu.memory_space<vmem>>, vector<32x128xf32>
    %c0_9 = arith.constant 0 : index
    %c0_10 = arith.constant 0 : index
    %13 = vector.load %arg6[%c0_9, %c0_10] : memref<32x128xf32, #tpu.memory_space<vmem>>, vector<32x128xf32>
    %cst = arith.constant 0.000000e+00 : f32
    %14 = vector.broadcast %cst : f32 to vector<32x128xf32>
    %15 = arith.subf %13, %14 : vector<32x128xf32>
    %16 = arith.subf %11, %15 : vector<32x128xf32>
    %cst_11 = arith.constant 5.000000e-01 : f32
    %17 = vector.broadcast %cst_11 : f32 to vector<32x128xf32>
    %18 = arith.mulf %16, %17 : vector<32x128xf32>
    %19 = arith.addf %12, %18 : vector<32x128xf32>
    %cst_12 = arith.constant 1.000000e+00 : f32
    %20 = vector.broadcast %cst_12 : f32 to vector<32x128xf32>
    %21 = arith.cmpf oge, %19, %20 : vector<32x128xf32>
    %22 = arith.extui %21 : vector<32x128xi1> to vector<32x128xi32>
    %23 = arith.sitofp %22 : vector<32x128xi32> to vector<32x128xf32>
    %24 = arith.truncf %23 : vector<32x128xf32> to vector<32x128xbf16>
    %c0_13 = arith.constant 0 : index
    %c0_14 = arith.constant 0 : index
    %c0_15 = arith.constant 0 : index
    %25 = vector.load %arg5[%c0_13, %c0_14, %c0_15] : memref<1x32x128xbf16, #tpu.memory_space<vmem>>, vector<1x32x128xbf16>
    %26 = vector.shape_cast %25 : vector<1x32x128xbf16> to vector<32x128xbf16>
    %27 = vector.shape_cast %24 : vector<32x128xbf16> to vector<1x32x128xbf16>
    tpu.vector_store %arg5[%c0_13, %c0_14, %c0_15], %27 {strides = array<i32>} : memref<1x32x128xbf16, #tpu.memory_space<vmem>>, vector<1x32x128xbf16>,
    %cst_16 = arith.constant 0.000000e+00 : f32
    %28 = vector.broadcast %cst_16 : f32 to vector<32x128xf32>
    %29 = arith.select %21, %28, %19 : vector<32x128xi1>, vector<32x128xf32>
    %c0_17 = arith.constant 0 : index
    %c0_18 = arith.constant 0 : index
    %30 = vector.load %arg6[%c0_17, %c0_18] : memref<32x128xf32, #tpu.memory_space<vmem>>, vector<32x128xf32>
    tpu.vector_store %arg6[%c0_17, %c0_18], %29 {strides = array<i32>} : memref<32x128xf32, #tpu.memory_space<vmem>>, vector<32x128xf32>,
    return
  }
  func.func @transform_0(%arg0: i32, %arg1: i32) -> (i32, i32) {
    %c0_i32 = arith.constant 0 : i32
    %c0_i32_0 = arith.constant 0 : i32
    %c0_i32_1 = arith.constant 0 : i32
    return %c0_i32, %c0_i32_0 : i32, i32
  }
  func.func @transform_1(%arg0: i32, %arg1: i32) -> (i32, i32) {
    %c0_i32 = arith.constant 0 : i32
    %c0_i32_0 = arith.constant 0 : i32
    %c0_i32_1 = arith.constant 0 : i32
    return %c0_i32, %c0_i32_0 : i32, i32
  }
  func.func @transform_2(%arg0: i32, %arg1: i32) -> (i32, i32, i32) {
    %c0_i32 = arith.constant 0 : i32
    %c0_i32_0 = arith.constant 0 : i32
    return %arg1, %arg0, %c0_i32 : i32, i32, i32
  }
  func.func @transform_3(%arg0: i32, %arg1: i32) -> (i32, i32, i32) {
    %c0_i32 = arith.constant 0 : i32
    %c0_i32_0 = arith.constant 0 : i32
    return %arg1, %arg0, %c0_i32 : i32, i32, i32
  }
}

</mosaic_0001>

<bundles_post_ra>
// kernel: tile.14
= control target key start
LH: loop header
LB: loop body
LE: loop exit
PB: predicated region body
PF: predicated region fallthrough
CT: control target
= control target key end

     0   :  { %s131_s10 = smov 120   ;;  %s132_s11 = smov 104   ;;  %vm3_vm0 = vcmask 64512   ;;  %vm9_vm1 = vcmask 1048512   ;;  %vm15_vm2 = vcmask 982912   ;;  %vm21_vm3 = vcmask 917312   ;;  %s207_s0 = inlined_call_operand.vmem [shape: f32[16,8], index: 0, kind: input, shape index: {}]   ;;  %s208_s1 = inlined_call_operand.vmem [shape: f32[1,128], index: 1, kind: output, shape index: {}]  }
   0x1   :  { %v101_v0 = vld [vmem:[%s207_s0 + $0xf] sm:$0x1]   ;;  %v103_v1 = vld [vmem:[%s207_s0 + $0xd] sm:$0x1]   ;;  %v102_v2 = vld [vmem:[%s207_s0 + $0xe] sm:$0x1]  }
   0x2   :  { %7 = vrot.lane.b32.xlu0 %v101_v0, %s131_s10  ;;  %19 = vrot.lane.b32.xlu1 %v103_v1, %s132_s11  ;;  %v104_v3 = vld [vmem:[%s207_s0 + $0xc] sm:$0x1]   ;;  %s133_s16 = smov 112   ;;  %s134_s17 = smov 96   ;;  %v105_v4 = vld [vmem:[%s207_s0 + $0xb] sm:$0x1]  }
   0x3   :  { %v106_v5 = vld [vmem:[%s207_s0 + $0xa] sm:$0x1]   ;;  %v2_v6 = vld [vmem:[%s207_s0] sm:$0x1]   ;;  %s135_s24 = smov 88   ;;  %s136_s25 = smov 80  }
   0x4   :  { %4 = vst.msk [vmem:[#allocation0] sm:$0x1] %vm3_vm0, %v2_v6   ;;  %v107_v7 = vld [vmem:[%s207_s0 + $0x9] sm:$0x1]   ;;  %v108_v8 = vld [vmem:[%s207_s0 + $0x8] sm:$0x1]  }
   0x5   :  { %s137_s30 = smov 72   ;;  %s138_s2 = smov 64   ;;  %v109_v9 = vld [vmem:[%s207_s0 + $0x7] sm:$0x1]   ;;  %v110_v10 = vld [vmem:[%s207_s0 + $0x6] sm:$0x1]  }
   0x6   :  { %13 = vrot.lane.b32.xlu0 %v102_v2, %s133_s16  ;;  %25 = vrot.lane.b32.xlu1 %v104_v3, %s134_s17  ;;  %s139_s7 = smov 56   ;;  %s140_s8 = smov 48   ;;  %v111_v11 = vld [vmem:[%s207_s0 + $0x5] sm:$0x1]   ;;  %v112_v12 = vld [vmem:[%s207_s0 + $0x4] sm:$0x1]  }
   0x7   :  { %s141_s13 = smov 40   ;;  %s142_s14 = smov 32   ;;  %v113_v13 = vld [vmem:[%s207_s0 + $0x3] sm:$0x1]   ;;  %v114_v14 = vld [vmem:[%s207_s0 + $0x2] sm:$0x1]  }
   0x8   :  { %s143_s19 = smov 24   ;;  %s144_s20 = smov 16   ;;  %v115_v15 = vld [vmem:[%s207_s0 + $0x1] sm:$0x1]   ;;  %vm27_vm4 = vcmask 851712   ;;  %vm33_vm5 = vcmask 786112  }
   0x9   :  { %s145_s0 = smov 8   ;;  %vm39_vm6 = vcmask 720512   ;;  %vm45_vm7 = vcmask 654912   ;;  %vm51_vm8 = vcmask 589312   ;;  %vm57_vm9 = vcmask 523712  }
   0xa   :  { %31 = vrot.lane.b32.xlu0 %v105_v4, %s135_s24  ;;  %37 = vrot.lane.b32.xlu1 %v106_v5, %s136_s25  ;;  %vm63_vm10 = vcmask 458112   ;;  %vm69_vm11 = vcmask 392512   ;;  %vm75_vm12 = vcmask 326912   ;;  %vm81_vm13 = vcmask 261312  }
   0xb   :  { %vm87_vm14 = vcmask 195712   ;;  %vm93_vm15 = vcmask 130112  }
   0xe   :  { %43 = vrot.lane.b32.xlu0 %v107_v7, %s137_s30  ;;  %49 = vrot.lane.b32.xlu1 %v108_v8, %s138_s2 }
  0x12   :  { %55 = vrot.lane.b32.xlu0 %v109_v9, %s139_s7  ;;  %61 = vrot.lane.b32.xlu1 %v110_v10, %s140_s8 }
  0x16   :  { %67 = vrot.lane.b32.xlu0 %v111_v11, %s141_s13  ;;  %73 = vrot.lane.b32.xlu1 %v112_v12, %s142_s14 }
  0x1a   :  { %79 = vrot.lane.b32.xlu0 %v113_v13, %s143_s19  ;;  %85 = vrot.lane.b32.xlu1 %v114_v14, %s144_s20 }
  0x1e   :  { %91 = vrot.lane.b32.xlu0 %v115_v15, %s145_s0 }
  0x74   :  { %v8_v16 = vpop.permute.xlu0 %7   ;;  %v20_v17 = vpop.permute.xlu1 %19  }
  0x75   :  { %10 = vst.msk [vmem:[#allocation0] sm:$0x1] %vm9_vm1, %v8_v16  }
  0x78   :  { %v14_v18 = vpop.permute.xlu0 %13   ;;  %v26_v19 = vpop.permute.xlu1 %25  }
  0x79   :  { %16 = vst.msk [vmem:[#allocation0] sm:$0x1] %vm15_vm2, %v14_v18  }
  0x7a   :  { %22 = vst.msk [vmem:[#allocation0] sm:$0x1] %vm21_vm3, %v20_v17  }
  0x7b   :  { %28 = vst.msk [vmem:[#allocation0] sm:$0x1] %vm27_vm4, %v26_v19  }
  0x7c   :  { %v32_v20 = vpop.permute.xlu0 %31   ;;  %v38_v21 = vpop.permute.xlu1 %37  }
  0x7d   :  { %34 = vst.msk [vmem:[#allocation0] sm:$0x1] %vm33_vm5, %v32_v20  }
  0x7e   :  { %40 = vst.msk [vmem:[#allocation0] sm:$0x1] %vm39_vm6, %v38_v21  }
  0x80   :  { %v44_v22 = vpop.permute.xlu0 %43   ;;  %v50_v23 = vpop.permute.xlu1 %49  }
  0x81   :  { %46 = vst.msk [vmem:[#allocation0] sm:$0x1] %vm45_vm7, %v44_v22  }
  0x82   :  { %52 = vst.msk [vmem:[#allocation0] sm:$0x1] %vm51_vm8, %v50_v23  }
  0x84   :  { %v56_v24 = vpop.permute.xlu0 %55   ;;  %v62_v25 = vpop.permute.xlu1 %61  }
  0x85   :  { %58 = vst.msk [vmem:[#allocation0] sm:$0x1] %vm57_vm9, %v56_v24  }
  0x86   :  { %64 = vst.msk [vmem:[#allocation0] sm:$0x1] %vm63_vm10, %v62_v25  }
  0x88   :  { %v68_v26 = vpop.permute.xlu0 %67   ;;  %v74_v27 = vpop.permute.xlu1 %73  }
  0x89   :  { %70 = vst.msk [vmem:[#allocation0] sm:$0x1] %vm69_vm11, %v68_v26  }
  0x8a   :  { %76 = vst.msk [vmem:[#allocation0] sm:$0x1] %vm75_vm12, %v74_v27  }
  0x8c   :  { %v80_v28 = vpop.permute.xlu0 %79   ;;  %v86_v29 = vpop.permute.xlu1 %85  }
  0x8d   :  { %82 = vst.msk [vmem:[#allocation0] sm:$0x1] %vm81_vm13, %v80_v28  }
  0x8e   :  { %88 = vst.msk [vmem:[#allocation0] sm:$0x1] %vm87_vm14, %v86_v29  }
  0x90   :  { %v92_v30 = vpop.permute.xlu0 %91  }
  0x91   :  { %94 = vst.msk [vmem:[#allocation0] sm:$0x1] %vm93_vm15, %v92_v30  }
  0x98   :  { %v98_v31 = vld [vmem:[#allocation0] sm:$0x1] }
  0x99   :  { %100 = vst [vmem:[%s208_s1] sm:$0x1] %v98_v31 }

// kernel: conv_bn_lif_forward.2
= control target key start
LH: loop header
LB: loop body
LE: loop exit
PB: predicated region body
PF: predicated region fallthrough
CT: control target
= control target key end

     0   :  { %s1207_s15 = smov 0   ;;  %s1362_s0 = inlined_call_operand.vmem [shape: bf16[8,16,64], index: 0, kind: input, shape index: {}]   ;;  %s1363_s1 = inlined_call_operand.vmem [shape: bf16[3,64,128], index: 1, kind: input, shape index: {}]   ;;  %s1364_s2 = inlined_call_operand.vmem [shape: bf16[4,32,128], index: 2, kind: output, shape index: {0}]   ;;  %s1365_s3 = inlined_call_operand.vmem [shape: f32[4,1,128], index: 3, kind: output, shape index: {1}]   ;;  %s1366_s4 = inlined_call_operand.vmem [shape: f32[4,1,128], index: 4, kind: output, shape index: {2}]  }
   0x1 LB: > { %s1213_s16 = sadd.s32 4294967295, %s1178_s15   ;;  %p927_p0 = scmp.ge.s32.totalorder %s1178_s15, 1  ;;  %s1178_s15 = sphi %s1207_s15, %s15_s15  }
   0x2   : > { %p169_p1 = scmp.lt.s32.totalorder %s1178_s15, 5 }
   0x4   : > { %p170_p2 = pnand %p927_p0, %p169_p1 }
   0x5   : > { %v1142_v0 = vld [vmem:[%s1363_s1 + $0x20] sm:$0xff] (!%p170_p2)   ;;  %v1180_v1 = vmov (!%p170_p2), 0.0   ;;  %v1144_v3 = vld [vmem:[%s1363_s1 + $0x28] sm:$0xff] (!%p170_p2)   ;;  %vm1181_vm0 = vmmov (!%p170_p2), 0   ;;  %s928_s23 = sshll.u32 (!%p170_p2), %s1213_s16, 1  ;;  %v1146_v5 = vld [vmem:[%s1363_s1 + $0x30] sm:$0xff] (!%p170_p2)  }
   0x6   : > { %173 = sbr.rel (%p170_p2) target bundleno = 327 (0x147), region = 28  ;;  %1060 = vmatprep.subr.bf16.mxu0 (!%p170_p2), %v1180_v1  ;;  %1072 = vmatprep.subr.bf16.mxu1 (!%p170_p2), %v1180_v1  ;;  %v1143_v2 = vld [vmem:[%s1363_s1] sm:$0xff] (!%p170_p2)   ;;  %v1145_v4 = vld [vmem:[%s1363_s1 + $0x8] sm:$0xff] (!%p170_p2)   ;;  %p203_p3 = scmp.lt.s32.totalorder (!%p170_p2), %s928_s23, 7  ;;  %v1147_v6 = vld [vmem:[%s1363_s1 + $0x10] sm:$0xff] (!%p170_p2)   ;;  %vm261_vm1 = vcmask (!%p170_p2), 523264  }
   0x7   : > { %1061 = vmatpush3.bf16.msra.mxu0 (!%p170_p2), %v1142_v0  ;;  %1068 = vmatprep.mubr.msk.bf16.mxu0 (!%p170_p2), %vm1181_vm0, %v1180_v1  ;;  %v1148_v7 = vld [vmem:[%s1363_s1 + $0x38] sm:$0xff] (!%p170_p2)   ;;  %v1151_v9 = vld [vmem:[%s1363_s1 + $0x40] sm:$0xff] (!%p170_p2)   ;;  %v1154_v14 = vld [vmem:[%s1363_s1 + $0x48] sm:$0xff] (!%p170_p2)   ;;  %p209_p4 = scmp.lt.s32.totalorder (!%p170_p2), %s1213_s16, 3 }
   0x8   : > { %1062 = vmatprep.subr.bf16.mxu0 (!%p170_p2), %v1180_v1  ;;  %1073 = vmatpush3.bf16.msra.mxu1 (!%p170_p2), %v1143_v2  ;;  %v1150_v8 = vld [vmem:[%s1363_s1 + $0x18] sm:$0xff] (!%p170_p2)   ;;  %v1153_v12 = vld [vmem:[%s1363_s1 + $0x20] sm:$0xff] (!%p170_p2)   ;;  %v1155_v15 = vld [vmem:[%s1363_s1 + $0x28] sm:$0xff] (!%p170_p2)  }
   0x9   : > { %1074 = vmatprep.subr.bf16.mxu1 (!%p170_p2), %v1180_v1  ;;  %1080 = vmatprep.mubr.msk.bf16.mxu1 (!%p170_p2), %vm1181_vm0, %v1180_v1  ;;  %v1156_v17 = vld [vmem:[%s1363_s1 + $0x50] sm:$0xff] (!%p170_p2)   ;;  %v1158_v21 = vld [vmem:[%s1363_s1 + $0x58] sm:$0xff] (!%p170_p2)   ;;  %v1161_v24 = vld [vmem:[%s1363_s1] sm:$0xff] (!%p170_p2)  }
   0xa   : > { %v1157_v18 = vld [vmem:[%s1363_s1 + $0x30] sm:$0xff] (!%p170_p2)   ;;  %v1160_v22 = vld [vmem:[%s1363_s1 + $0x38] sm:$0xff] (!%p170_p2)   ;;  %v1164_v26 = vld [vmem:[%s1363_s1 + $0x40] sm:$0xff] (!%p170_p2)  }
   0xb   : > { %1063 = vmatpush3.bf16.msra.mxu0 (!%p170_p2), %v1144_v3  ;;  %v1163_v27 = vld [vmem:[%s1363_s1 + $0x8] sm:$0xff] (!%p170_p2)   ;;  %v1165_v30 = vld [vmem:[%s1363_s1 + $0x10] sm:$0xff] (!%p170_p2)   ;;  %v1167_v33 = vld [vmem:[%s1363_s1 + $0x18] sm:$0xff] (!%p170_p2)  }
   0xc   : > { %1064 = vmatprep.subr.bf16.mxu0 (!%p170_p2), %v1180_v1  ;;  %1075 = vmatpush3.bf16.msra.mxu1 (!%p170_p2), %v1145_v4  ;;  %v1166_v29 = vld [vmem:[%s1363_s1 + $0x48] sm:$0xff] (!%p170_p2)   ;;  %v1169_v32 = vld [vmem:[%s1363_s1 + $0x50] sm:$0xff] (!%p170_p2)   ;;  %v1170_v36 = vld [vmem:[%s1363_s1 + $0x58] sm:$0xff] (!%p170_p2)  }
   0xd   : > { %s1368_s23 = smov (!%p203_p3, %s928_s23), 7  ;;  %1076 = vmatprep.subr.bf16.mxu1 %v1180_v1  ;;  %s1370_s16 = smov (!%p209_p4, %s1213_s16), 3 }
   0xe   : > { %s1013_s30 = sshll.u32 %s1368_s23, 3  ;;  %s216_s28 = scalar_lea.vmem %s1365_s3, %s1370_s16 }
   0xf   : > { %s1249_s7 = scalar_lea.vmem %s1362_s0, %s1013_s30  ;;  %1065 = vmatpush3.bf16.msra.mxu0 %v1146_v5  ;;  %s219_s5 = scalar_lea.vmem %s1366_s4, %s1370_s16 }
  0x10   : > { %1066 = vmatprep.subr.bf16.mxu0 %v1180_v1  ;;  %1077 = vmatpush3.bf16.msra.mxu1 %v1147_v6  ;;  %v1149_v10 = vld [vmem:[%s1249_s7] sm:$0xff]   ;;  %v1162_v25 = vld [vmem:[%s1249_s7 + $0x8] sm:$0xff]  }
  0x11   : > { %1078 = vmatprep.subr.bf16.mxu1 %v1180_v1  ;;  %v1152_v11 = vld [vmem:[%s1249_s7] sm:$0xff]   ;;  %v1171_v28 = vld [vmem:[%s1249_s7 + $0x8] sm:$0xff]  }
  0x12   : > { %v1159_v13 = vld [vmem:[%s1249_s7] sm:$0xff]   ;;  %v689_v31 = vshll.u32 %v1171_v28, 16  ;;  %v687_v34 = vshrl.u32 %v1171_v28, 16  ;;  %v1168_v37 = vld [vmem:[%s1249_s7 + $0x8] sm:$0xff]   ;;  %s1014_s7 = sshll.u32 %s1370_s16, 4 }
  0x13   : > { %1067 = vmatpush3.bf16.msra.mxu0 %v1148_v7  ;;  %v418_v16 = vshll.u32 %v1159_v13, 16  ;;  %v416_v19 = vshrl.u32 %v1159_v13, 16  ;;  %s213_s25 = scalar_lea.vmem %s1364_s2, %s1014_s7 }
  0x14   : > { %1079 = vmatpush3.bf16.msra.mxu1 %v1150_v8  ;;  %1084 = vmatprep.subr.bf16.mxu0 %v1180_v1  ;;  %v691_v35 = vrot.slane %v689_v31, 1 }
  0x15   : > { %1096 = vmatprep.subr.bf16.mxu1 %v1180_v1  ;;  %v420_v20 = vrot.slane %v418_v16, 1 }
  0x16   : > { %1069 = vmatmul.mubr.msk.bf16.vlgmr.msra.gmra.mrb[0].mxu0 %vm261_vm1, %v1149_v10  ;;  %v692_v38 = vor.u32 %v691_v35, %v687_v34 }
  0x17   : > { %1085 = vmatpush3.bf16.msra.mxu0 %v1151_v9  ;;  %1081 = vmatmul.mubr.msk.bf16.vlgmr.msra.gmra.mrb[0].mxu1 %vm261_vm1, %v1152_v11  ;;  %v421_v23 = vor.u32 %v420_v20, %v416_v19 }
  0x18   : > { %1086 = vmatprep.subr.bf16.mxu0 %v1180_v1  ;;  %1097 = vmatpush3.bf16.msra.mxu1 %v1153_v12 }
  0x19   : > { %1098 = vmatprep.subr.bf16.mxu1 %v1180_v1  ;;  %1092 = vmatprep.mubr.msk.bf16.mxu0 %vm1181_vm0, %v1180_v1 }
  0x1a   : > { %1104 = vmatprep.mubr.msk.bf16.mxu1 %vm1181_vm0, %v1180_v1 }
  0x1b   : > { %1087 = vmatpush3.bf16.msra.mxu0 %v1154_v14 }
  0x1c   : > { %1088 = vmatprep.subr.bf16.mxu0 %v1180_v1  ;;  %1099 = vmatpush3.bf16.msra.mxu1 %v1155_v15 }
  0x1d   : > { %1100 = vmatprep.subr.bf16.mxu1 %v1180_v1 }
  0x1f   : > { %1089 = vmatpush3.bf16.msra.mxu0 %v1156_v17 }
  0x20   : > { %1090 = vmatprep.subr.bf16.mxu0 %v1180_v1  ;;  %1101 = vmatpush3.bf16.msra.mxu1 %v1157_v18 }
  0x21   : > { %1102 = vmatprep.subr.bf16.mxu1 %v1180_v1 }
  0x23   : > { %1091 = vmatpush3.bf16.msra.mxu0 %v1158_v21 }
  0x24   : > { %1103 = vmatpush3.bf16.msra.mxu1 %v1160_v22  ;;  %1108 = vmatprep.subr.bf16.mxu0 %v1180_v1 }
  0x25   : > { %1120 = vmatprep.subr.bf16.mxu1 %v1180_v1 }
  0x26   : > { %1093 = vmatmul.mubr.msk.bf16.vlgmr.msra.gmra.mrb[4].mxu0 %vm261_vm1, %v421_v23 }
  0x27   : > { %1109 = vmatpush3.bf16.msra.mxu0 %v1161_v24  ;;  %1105 = vmatmul.mubr.msk.bf16.vlgmr.msra.gmra.mrb[4].mxu1 %vm261_vm1, %v1162_v25 }
  0x28   : > { %1110 = vmatprep.subr.bf16.mxu0 %v1180_v1  ;;  %1121 = vmatpush3.bf16.msra.mxu1 %v1164_v26 }
  0x29   : > { %1122 = vmatprep.subr.bf16.mxu1 %v1180_v1  ;;  %1116 = vmatprep.mubr.msk.bf16.mxu0 %vm1181_vm0, %v1180_v1 }
  0x2a   : > { %1128 = vmatprep.mubr.msk.bf16.mxu1 %vm1181_vm0, %v1180_v1 }
  0x2b   : > { %1111 = vmatpush3.bf16.msra.mxu0 %v1163_v27 }
  0x2c   : > { %1112 = vmatprep.subr.bf16.mxu0 %v1180_v1  ;;  %1123 = vmatpush3.bf16.msra.mxu1 %v1166_v29 }
  0x2d   : > { %1124 = vmatprep.subr.bf16.mxu1 %v1180_v1 }
  0x2f   : > { %1113 = vmatpush3.bf16.msra.mxu0 %v1165_v30 }
  0x30   : > { %1114 = vmatprep.subr.bf16.mxu0 %v1180_v1  ;;  %1125 = vmatpush3.bf16.msra.mxu1 %v1169_v32 }
  0x31   : > { %1126 = vmatprep.subr.bf16.mxu1 %v1180_v1 }
  0x33   : > { %1115 = vmatpush3.bf16.msra.mxu0 %v1167_v33 }
  0x34   : > { %1127 = vmatpush3.bf16.msra.mxu1 %v1170_v36 }
  0x36   : > { %1117 = vmatmul.mubr.msk.bf16.vlgmr.msra.gmra.mrb[8].mxu0 %vm261_vm1, %v1168_v37 }
  0x37   : > { %1129 = vmatmul.mubr.msk.bf16.vlgmr.msra.gmra.mrb[8].mxu1 %vm261_vm1, %v692_v38 }
  0xe9   : > { %v299_v39 = vpop.f32.mrb[0].mxu0 }
  0xea   : > { %306 = vst [vmem:[#allocation2] sm:$0xff] %v299_v39  ;;  %v1070_v40 = vpop.f32.mrb[1].mxu0  ;;  %v386_v41 = vpop.f32.mrb[0].mxu1 }
  0xeb   : > { %v302_v42 = vpop.f32.mrb[2].mxu0  ;;  %v1082_v43 = vpop.f32.mrb[1].mxu1 }
  0xec   : > { %307 = vst [vmem:[#allocation2 + $0x8] sm:$0xff] %v302_v42  ;;  %v1071_v44 = vpop.f32.mrb[3].mxu0  ;;  %v389_v45 = vpop.f32.mrb[2].mxu1 }
  0xed   : > { %v1083_v46 = vpop.f32.mrb[3].mxu1 }
  0xf3   : > { %v308_v47 = vld [vmem:[#allocation2 + $0x1] sm:$0xff]  ;;  %v309_v48 = vld [vmem:[#allocation2 + $0x9] sm:$0x7f] }
  0xf4   : > { %v393_v49 = vadd.f32 %v386_v41, %v308_v47  ;;  %v394_v50 = vadd.f32 %v389_v45, %v309_v48 }
  0xf6   : > { %395 = vst [vmem:[#allocation2 + $0x1] sm:$0xff] %v393_v49  ;;  %396 = vst [vmem:[#allocation2 + $0x9] sm:$0x7f] %v394_v50 }
  0xf9   : > { %v483_v51 = vpop.f32.mrb[4].mxu0 }
  0xfa   : > { %v1094_v52 = vpop.f32.mrb[5].mxu0  ;;  %v571_v53 = vpop.f32.mrb[4].mxu1 }
  0xfb   : > { %v486_v54 = vpop.f32.mrb[6].mxu0  ;;  %578 = vst [vmem:[#allocation2 + $0x10] sm:$0xff] %v571_v53  ;;  %v1106_v55 = vpop.f32.mrb[5].mxu1 }
  0xfc   : > { %v1095_v56 = vpop.f32.mrb[7].mxu0  ;;  %v574_v57 = vpop.f32.mrb[6].mxu1 }
  0xfd   : > { %v397_v58 = vld [vmem:[#allocation2] sm:$0xff]  ;;  %v398_v59 = vld [vmem:[#allocation2 + $0x8] sm:$0x7f]  ;;  %579 = vst [vmem:[#allocation2 + $0x18] sm:$0xff] %v574_v57  ;;  %v1107_v60 = vpop.f32.mrb[7].mxu1 }
  0xfe   : > { %v490_v61 = vadd.f32 %v483_v51, %v397_v58  ;;  %v491_v62 = vadd.f32 %v486_v54, %v398_v59 }
 0x100   : > { %492 = vst [vmem:[#allocation2] sm:$0xff] %v490_v61  ;;  %493 = vst [vmem:[#allocation2 + $0x8] sm:$0x7f] %v491_v62 }
 0x104   : > { %v580_v0 = vld [vmem:[#allocation2 + $0x11] sm:$0xff]  ;;  %v581_v6 = vld [vmem:[#allocation2 + $0x19] sm:$0x7f] }
 0x107   : > { %v766_v63 = vld [vmem:[#allocation2 + $0x8] sm:$0xff] }
 0x108   : > { %v1022_v1 = vpack.c.bf16 %v766_v63, %v490_v61  ;;  %v789_v15 = vadd.f32 %v766_v63, %v490_v61 }
 0x109   : > { %v658_v2 = vpop.f32.mrb[8].mxu0 }
 0x10a   : > { %1023 = vst [vmem:[%s213_s25] sm:$0xff] %v1022_v1   ;;  %v665_v3 = vadd.f32 %v658_v2, %v580_v0  ;;  %v1118_v4 = vpop.f32.mrb[9].mxu0  ;;  %v754_v5 = vpop.f32.mrb[8].mxu1 }
 0x10b   : > { %v661_v7 = vpop.f32.mrb[10].mxu0  ;;  %v1130_v8 = vpop.f32.mrb[9].mxu1 }
 0x10c   : > { %667 = vst [vmem:[#allocation2 + $0x11] sm:$0xff] %v665_v3  ;;  %v666_v9 = vadd.f32 %v661_v7, %v581_v6  ;;  %v1119_v10 = vpop.f32.mrb[11].mxu0  ;;  %v757_v11 = vpop.f32.mrb[10].mxu1 }
 0x10d   : > { %v1131_v12 = vpop.f32.mrb[11].mxu1 }
 0x10e   : > { %668 = vst [vmem:[#allocation2 + $0x19] sm:$0x7f] %v666_v9 }
 0x113   : > { %v669_v13 = vld [vmem:[#allocation2 + $0x10] sm:$0xff] }
 0x114   : > { %v761_v14 = vadd.f32 %v754_v5, %v669_v13 }
 0x115   : > { %v670_v16 = vld [vmem:[#allocation2 + $0x18] sm:$0x7f] }
 0x116   : > { %763 = vst [vmem:[#allocation2 + $0x10] sm:$0xff] %v761_v14  ;;  %v790_v17 = vadd.f32 %v789_v15, %v761_v14  ;;  %v762_v18 = vadd.f32 %v757_v11, %v670_v16 }
 0x118   : > { %764 = vst [vmem:[#allocation2 + $0x18] sm:$0x7f] %v762_v18 }
 0x11f   : > { %v768_v19 = vld [vmem:[#allocation2 + $0x18] sm:$0xff] }
 0x120   : > { %v1027_v20 = vpack.c.bf16 %v768_v19, %v761_v14  ;;  %v791_v21 = vadd.f32 %v790_v17, %v768_v19 }
 0x122   : > { %1029 = vst [vmem:[%s213_s25 + $0x8] sm:$0xff] %v1027_v20   ;;  %v792_v22 = vrot.slane %v791_v21, 4 }
 0x124   : > { %v793_v23 = vadd.f32 %v792_v22, %v791_v21 }
 0x126   : > { %v794_v24 = vrot.slane %v793_v23, 2 }
 0x128   : > { %v795_v25 = vadd.f32 %v794_v24, %v793_v23 }
 0x12a   : > { %v796_v26 = vrot.slane %v795_v25, 1 }
 0x12c   : > { %v797_v27 = vadd.f32 %v796_v26, %v795_v25 }
 0x12e   : > { %v798_v28 = vmul.f32 0.03125, %v797_v27  ;;  %816 = vst [vmem:[%s216_s28] sm:$0x1] %v797_v27 }
 0x130   : > { %v799_v29 = vsub.f32 %v490_v61, %v798_v28  ;;  %v800_v30 = vsub.f32 %v766_v63, %v798_v28  ;;  %v801_v31 = vsub.f32 %v761_v14, %v798_v28  ;;  %v802_v32 = vsub.f32 %v768_v19, %v798_v28 }
 0x132   : > { %v803_v33 = vmul.f32 %v799_v29, %v799_v29  ;;  %v804_v34 = vmul.f32 %v800_v30, %v800_v30  ;;  %v805_v35 = vmul.f32 %v801_v31, %v801_v31  ;;  %v806_v37 = vmul.f32 %v802_v32, %v802_v32 }
 0x134   : > { %v807_v36 = vadd.f32 %v804_v34, %v803_v33 }
 0x136   : > { %v808_v38 = vadd.f32 %v807_v36, %v805_v35 }
 0x138   : > { %v809_v39 = vadd.f32 %v808_v38, %v806_v37 }
 0x13a   : > { %v810_v40 = vrot.slane %v809_v39, 4 }
 0x13c   : > { %v811_v41 = vadd.f32 %v810_v40, %v809_v39 }
 0x13e   : > { %v812_v42 = vrot.slane %v811_v41, 2 }
 0x140   : > { %v813_v43 = vadd.f32 %v812_v42, %v811_v41 }
 0x142   : > { %v814_v44 = vrot.slane %v813_v43, 1 }
 0x144   : > { %v815_v45 = vadd.f32 %v814_v44, %v813_v43 }
 0x146   : > { %817 = vst [vmem:[%s219_s5] sm:$0x1] %v815_v45 }
 0x147 PF: > { %s15_s15 = sadd.s32 1, %s1178_s15  }
 0x148   : > { %p12_p5 = scmp.ge.s32.totalorder %s15_s15, 6  }
 0x14a   :  { %14 = sbr.rel (!%p12_p5) target bundleno = 1 (0x1), region = 85 }

// kernel: conv_bn_lif_forward.3
= control target key start
LH: loop header
LB: loop body
LE: loop exit
PB: predicated region body
PF: predicated region fallthrough
CT: control target
= control target key end

     0   :  { %s507_s12 = smov 0   ;;  %s509_s13 = smov 0   ;;  %s550_s0 = inlined_call_operand.vmem [shape: f32[1,128], index: 0, kind: input, shape index: {}]   ;;  %s551_s1 = inlined_call_operand.vmem [shape: f32[1,128], index: 1, kind: input, shape index: {}]   ;;  %s552_s2 = inlined_call_operand.vmem [shape: bf16[4,32,128], index: 2, kind: input, shape index: {}]   ;;  %s553_s3 = inlined_call_operand.vmem [shape: bf16[4,32,128], index: 3, kind: output, shape index: {}]  }
   0x1   :  { %s511_s14 = smov 0  }
   0x2 LB: > { %s22_s15 = sadd.s32 1, %s479_s13  ;;  %p395_p0 = scmp.ge.s32.totalorder %s483_s14, 1  ;;  %s483_s14 = sphi %s511_s14, %s13_s14   ;;  %s479_s13 = sphi %s509_s13, %s555_s13   ;;  %s475_s12 = sphi %s507_s12, %s554_s12  }
   0x3   : > { %p23_p1 = scmp.ge.s32.totalorder %s22_s15, 4  ;;  %p158_p2 = scmp.lt.s32.totalorder %s483_s14, 5 }
   0x5   : > { %s557_s15 = smov (%p23_p1, %s22_s15), 0  ;;  %p159_p3 = pnand %p395_p0, %p158_p2 }
   0x6   : > { %p191_p4 = scmp.lt.s32.totalorder (!%p159_p3), %s475_s12, 3  ;;  %p400_p5 = scmp.ne.s32.totalorder (!%p159_p3), %s475_s12, 0 }
   0x7   : > { %162 = sbr.rel (%p159_p3) target bundleno = 41 (0x29), region = 32 }
   0xe   : > { %s192_s16 = scalar_select %p191_p4, %s475_s12, 3 }
   0xf   : > { %213 = sbr.rel (%p400_p5) target bundleno = 22 (0x16), region = 36  ;;  %v485_v0 = vmov (!%p400_p5), 0.0  }
  0x10   : > { %s413_s17 = sshll.u32 %s192_s16, 4  ;;  %214 = vst [vmem:[#allocation2] sm:$0xff] (!%p400_p5), %v485_v0  ;;  %215 = vst [vmem:[#allocation2 + $0x8] sm:$0xff] (!%p400_p5), %v485_v0 }
  0x11   : > { %s198_s20 = scalar_lea.vmem %s552_s2, %s413_s17  ;;  %s531_s23 = scalar_lea.vmem %s553_s3, %s413_s17  ;;  %216 = vst [vmem:[#allocation2 + $0x10] sm:$0xff] (!%p400_p5), %v485_v0  ;;  %217 = vst [vmem:[#allocation2 + $0x18] sm:$0xff] (!%p400_p5), %v485_v0 }
  0x16 PF: > { %v420_v1 = vld [vmem:[%s198_s20] sm:$0xff]   ;;  %v433_v5 = vld [vmem:[%s198_s20 + $0x8] sm:$0xff]   ;;  %v486_v33 = vmov 0.0  }
  0x17   : > { %v401_v2 = vld [vmem:[%s550_s0] ss:$0 sm:$0xff]  ;;  %v421_v3 = vunpack.c.l.bf16 %v420_v1  ;;  %v422_v4 = vunpack.c.h.bf16 %v420_v1  ;;  %v425_v7 = vunpack.c.l.bf16 %v433_v5  ;;  %v426_v8 = vunpack.c.h.bf16 %v433_v5  ;;  %v249_v12 = vld [vmem:[#allocation2 + $0x8] sm:$0xff] }
  0x18   : > { %v402_v6 = vld [vmem:[%s551_s1] ss:$0 sm:$0xff]  ;;  %v250_v17 = vld [vmem:[#allocation2 + $0x10] sm:$0xff]  ;;  %v251_v18 = vld [vmem:[#allocation2 + $0x18] sm:$0xff] }
  0x19   : > { %v233_v9 = vmul.f32 %v421_v3, %v401_v2  ;;  %v234_v10 = vmul.f32 %v422_v4, %v401_v2  ;;  %v248_v11 = vld [vmem:[#allocation2] sm:$0xff]  ;;  %v235_v13 = vmul.f32 %v425_v7, %v401_v2  ;;  %v236_v14 = vmul.f32 %v426_v8, %v401_v2 }
  0x1b   : > { %v244_v15 = vadd.f32 %v402_v6, %v233_v9  ;;  %v245_v16 = vadd.f32 %v402_v6, %v234_v10  ;;  %v246_v19 = vadd.f32 %v402_v6, %v235_v13  ;;  %v247_v20 = vadd.f32 %v402_v6, %v236_v14 }
  0x1d   : > { %v252_v21 = vsub.f32 %v244_v15, %v248_v11  ;;  %v253_v22 = vsub.f32 %v245_v16, %v249_v12  ;;  %v254_v23 = vsub.f32 %v246_v19, %v250_v17  ;;  %v255_v24 = vsub.f32 %v247_v20, %v251_v18 }
  0x1f   : > { %v256_v25 = vmul.f32 0.5, %v252_v21  ;;  %v257_v26 = vmul.f32 0.5, %v253_v22  ;;  %v258_v27 = vmul.f32 0.5, %v254_v23  ;;  %v259_v28 = vmul.f32 0.5, %v255_v24 }
  0x21   : > { %v260_v29 = vadd.f32 %v256_v25, %v248_v11  ;;  %v261_v30 = vadd.f32 %v257_v26, %v249_v12  ;;  %v262_v31 = vadd.f32 %v258_v27, %v250_v17  ;;  %v263_v32 = vadd.f32 %v259_v28, %v251_v18 }
  0x23   : > { %vm264_vm0 = vcmp.ge.f32.partialorder %v260_v29, 1.0  ;;  %vm265_vm1 = vcmp.ge.f32.partialorder %v261_v30, 1.0  ;;  %vm266_vm2 = vcmp.ge.f32.partialorder %v262_v31, 1.0  ;;  %vm267_vm3 = vcmp.ge.f32.partialorder %v263_v32, 1.0 }
  0x24   : > { %v403_v34 = vsel %vm264_vm0, 1.0, %v486_v33  ;;  %v404_v35 = vsel %vm265_vm1, 1.0, %v486_v33  ;;  %v405_v37 = vsel %vm266_vm2, 1.0, %v486_v33  ;;  %v406_v38 = vsel %vm267_vm3, 1.0, %v486_v33 }
  0x25   : > { %v428_v36 = vpack.c.bf16 %v404_v35, %v403_v34  ;;  %v296_v39 = vsel %vm264_vm0, 0.0, %v260_v29  ;;  %v431_v40 = vpack.c.bf16 %v406_v38, %v405_v37  ;;  %v297_v41 = vsel %vm265_vm1, 0.0, %v261_v30 }
  0x26   : > { %300 = vst [vmem:[#allocation2] sm:$0xff] %v296_v39  ;;  %v298_v42 = vsel %vm266_vm2, 0.0, %v262_v31  ;;  %v299_v43 = vsel %vm267_vm3, 0.0, %v263_v32  ;;  %301 = vst [vmem:[#allocation2 + $0x8] sm:$0xff] %v297_v41 }
  0x27   : > { %429 = vst [vmem:[%s531_s23] sm:$0xff] %v428_v36   ;;  %302 = vst [vmem:[#allocation2 + $0x10] sm:$0xff] %v298_v42 }
  0x28   : > { %303 = vst [vmem:[#allocation2 + $0x18] sm:$0xff] %v299_v43  ;;  %434 = vst [vmem:[%s531_s23 + $0x8] sm:$0xff] %v431_v40  }
  0x29 PF: > { %s13_s14 = sadd.s32 1, %s483_s14   ;;  %s554_s12 = smov %s479_s13 }
  0x2a   : > { %p10_p6 = scmp.ge.s32.totalorder %s13_s14, 6   ;;  %s555_s13 = smov %s557_s15 }
  0x2c   :  { %12 = sbr.rel (!%p10_p6) target bundleno = 2 (0x2), region = 66 }

</bundles_post_ra>
